<compile_context>
chip_gen: v6e
topology: v6e:2x2x1
jax: 0.10.0
libtpu: 0.0.40
codegen_flags: <defaults>
</compile_context>

<pallas_src>
import functools

import jax
import jax.numpy as jnp
from jax.experimental import pallas as pl
from jax.experimental.pallas import tpu as pltpu

LN_EPS = 1e-5  # PyTorch F.layer_norm default eps
LANE = 128


def _round_up(x, m):
    return (x + m - 1) // m * m


def _choose_batch_tile(B, block_b):
    """Pick the batch tile.

    * B <= 128: single grid step, round up to the 8-row sublane granule only
      (no 128-padding waste on tiny batches).
    * B  > 128: tile is a multiple of 128 (full MXU M-tiles on v5e), divides
      the 128-rounded batch exactly (no extra padding rows), is capped at
      block_b, and leaves >= 2 grid steps so v7x's 2 TensorCores both get work.
    """
    if B <= 128:
        return max(8, _round_up(B, 8))
    n128 = _round_up(B, LANE) // LANE          # batch measured in 128-row tiles
    max_m = max(1, block_b // LANE)
    for m in range(min(max_m, n128), 0, -1):
        if n128 % m == 0 and (n128 // m) >= 2:
            return m * LANE
    return LANE


# ------------------------------- kernel --------------------------------------

def _policy_kernel(zs_ref, w1_ref, b1_ref, w2_ref, b2_ref, w3_ref, b3_ref,
                   pre_ref):
    x = zs_ref[...]
    mxu_dtype = w1_ref.dtype  # bf16 (default) or f32

    def ln_relu(h):
        # F.layer_norm over last dim (default affine), f32 math.
        # Single pass over h: var = E[h^2] - mu^2; fused (h - mu) * rsqrt.
        mu = jnp.mean(h, axis=-1, keepdims=True)
        var = jnp.mean(h * h, axis=-1, keepdims=True) - mu * mu
        inv = jax.lax.rsqrt(var + LN_EPS)
        return jnp.maximum((h - mu) * inv, 0.0)  # activ = relu

    def linear(h, w_ref, b_ref):
        # Cast activations to the weight dtype only at the MXU boundary;
        # accumulate in f32; biases stay f32.
        return (jnp.dot(h.astype(mxu_dtype), w_ref[...],
                        preferred_element_type=jnp.float32)
                + b_ref[...])

    h1 = ln_relu(linear(x, w1_ref, b1_ref))
    h2 = ln_relu(linear(h1, w2_ref, b2_ref))
    pre_ref[...] = linear(h2, w3_ref, b3_ref)
    # action = tanh(pre) is applied in the wrapper on the *sliced* output —
    # avoids writing a second 128-lane-padded array back to HBM.


# ------------------------------- wrapper --------------------------------------

def prepare_policy_params(params, weights_dtype=jnp.bfloat16):
    """One-time preprocessing (hoisted out of the per-call forward path):
    lane-pads the final layer to a multiple of 128 and casts weights to the
    MXU dtype. Returns (prepared_params, action_dim)."""
    w1, b1, w2, b2, w3, b3 = params
    action_dim = w3.shape[1]
    pad_adim = _round_up(action_dim, LANE)
    if pad_adim != action_dim:
        w3 = jnp.pad(w3, ((0, 0), (0, pad_adim - action_dim)))
        b3 = jnp.pad(b3, ((0, 0), (0, pad_adim - action_dim)))
    w1 = w1.astype(weights_dtype)
    w2 = w2.astype(weights_dtype)
    w3 = w3.astype(weights_dtype)
    # Biases stay f32 (added after the f32 accumulation).
    return (w1, b1.astype(jnp.float32), w2, b2.astype(jnp.float32),
            w3, b3.astype(jnp.float32)), action_dim


@functools.partial(jax.jit, static_argnames=("action_dim", "block_b"))
def policy_forward(zs, prepared_params, action_dim, block_b=1024):
    """Returns (action, pre_activ) exactly like Policy.forward (discrete=False).

    `prepared_params` must come from prepare_policy_params (lane-padded w3/b3,
    MXU-dtype weights).
    """
    w1, b1, w2, b2, w3, b3 = prepared_params
    B, zs_dim = zs.shape
    hdim = w1.shape[1]
    pad_adim = w3.shape[1]
    w_item = jnp.dtype(w1.dtype).itemsize

    # ---- batch tiling (no wrapper-side pad unless B doesn't fit the tiles) ----
    bt = _choose_batch_tile(B, block_b)
    padded_B = _round_up(B, bt)
    if padded_B != B:
        zs = jnp.pad(zs, ((0, padded_B - B), (0, 0)))
    grid = (padded_B // bt,)

    # Weights/biases: constant index map + single buffer -> fetched once,
    # VMEM-resident, no double-buffer VMEM waste.
    def const2d(shape):
        return pl.BlockSpec(shape, lambda i: (0, 0), pipeline_mode=pl.Buffered(1))

    in_specs = [
        pl.BlockSpec((bt, zs_dim), lambda i: (i, 0)),   # zs tile (streamed)
        const2d((zs_dim, hdim)),                        # w1
        const2d((1, hdim)),                             # b1
        const2d((hdim, hdim)),                          # w2
        const2d((1, hdim)),                             # b2
        const2d((hdim, pad_adim)),                      # w3 (lane-padded)
        const2d((1, pad_adim)),                         # b3 (lane-padded)
    ]
    out_specs = pl.BlockSpec((bt, pad_adim), lambda i: (i, 0))   # pre_activ only
    out_shape = jax.ShapeDtypeStruct((padded_B, pad_adim), jnp.float32)

    # ---- explicit VMEM budget (safe on v5e/v6e/v7x) ----
    vmem_est = (
        2 * bt * zs_dim * 4                                   # zs tile, 2 buffers
        + 2 * bt * pad_adim * 4                               # pre out, 2 buffers
        + (zs_dim * hdim + hdim * hdim + hdim * pad_adim) * w_item   # weights, 1 buf
        + (2 * hdim + pad_adim) * 4                           # biases
        + 4 * bt * hdim * 4                                   # h1/h2/temps headroom
    )
    vmem_limit = int(min(max(2 * vmem_est, 32 << 20), 64 << 20))

    # Advisory cost estimate so XLA schedules the custom call sensibly.
    flops = 2 * padded_B * (zs_dim * hdim + hdim * hdim + hdim * pad_adim)
    transcendentals = 2 * padded_B  # one rsqrt per row per LayerNorm
    bytes_accessed = (
        zs.size * zs.dtype.itemsize
        + sum(int(a.size) * a.dtype.itemsize for a in (w1, b1, w2, b2, w3, b3))
        + padded_B * pad_adim * 4
    )
    cost = pl.CostEstimate(flops=int(flops),
                           transcendentals=int(transcendentals),
                           bytes_accessed=int(bytes_accessed))

    pre_pad = pl.pallas_call(
        _policy_kernel,
        out_shape=out_shape,
        grid=grid,
        in_specs=in_specs,
        out_specs=out_specs,
        compiler_params=pltpu.CompilerParams(
            dimension_semantics=("parallel",),
            vmem_limit_bytes=vmem_limit),
        cost_estimate=cost,
    )(zs, w1, b1, w2, b2, w3, b3)

    # Strip batch + lane padding, then apply tanh on the small real slice.
    pre_activ = pre_pad[:B, :action_dim]
    action = jnp.tanh(pre_activ)    # discrete=False -> torch.tanh
    return action, pre_activ


# ----------------------------- init & reference ------------------------------

def xavier_uniform(key, fan_in, fan_out, gain):
    bound = gain * jnp.sqrt(6.0 / (fan_in + fan_out))
    return jax.random.uniform(key, (fan_in, fan_out), jnp.float32, -bound, bound)


def init_policy_params(key, zs_dim, action_dim, hdim):
    # weight_init: xavier_uniform with gain = calculate_gain('relu') = sqrt(2), bias = 0
    gain = jnp.sqrt(2.0)
    k1, k2, k3 = jax.random.split(key, 3)
    w1 = xavier_uniform(k1, zs_dim, hdim, gain)
    w2 = xavier_uniform(k2, hdim, hdim, gain)
    w3 = xavier_uniform(k3, hdim, action_dim, gain)
    b1 = jnp.zeros((1, hdim), jnp.float32)
    b2 = jnp.zeros((1, hdim), jnp.float32)
    b3 = jnp.zeros((1, action_dim), jnp.float32)
    return (w1, b1, w2, b2, w3, b3)


def policy_forward_ref(zs, params):
    """Plain-JAX reference mirroring the PyTorch semantics."""
    w1, b1, w2, b2, w3, b3 = params

    def ln_relu(h):
        mu = jnp.mean(h, axis=-1, keepdims=True)
        var = jnp.mean((h - mu) ** 2, axis=-1, keepdims=True)
        return jnp.maximum((h - mu) / jnp.sqrt(var + LN_EPS), 0.0)

    h1 = ln_relu(zs @ w1 + b1)
    h2 = ln_relu(h1 @ w2 + b2)
    pre = h2 @ w3 + b3
    return jnp.tanh(pre), pre


if __name__ == "__main__":
    # Small shapes consistent with Policy(zs_dim, hdim, action_dim), scale_factor=1.0
    zs_dim, hdim, action_dim = 32, 32, 8
    key = jax.random.PRNGKey(0)
    k_zs, k_zs_big, k_params = jax.random.split(key, 3)
    params = init_policy_params(k_params, zs_dim, action_dim, hdim)

    # One-time param preprocessing (hoisted out of the forward path).
    prep_f32, adim = prepare_policy_params(params, weights_dtype=jnp.float32)
    prep_bf16, _ = prepare_policy_params(params)  # bf16 default

    # --- case 1: tiny batch (single grid step), f32 weights, tight check ---
    zs = jax.random.normal(k_zs, (8, zs_dim), jnp.float32)
    action, pre_activ = policy_forward(zs, prep_f32, adim)
    jax.block_until_ready((action, pre_activ))
    action_ref, pre_ref = policy_forward_ref(zs, params)
    assert action.shape == (8, action_dim) and pre_activ.shape == (8, action_dim)
    assert jnp.allclose(action, action_ref, atol=1e-4), "action mismatch (f32)"
    assert jnp.allclose(pre_activ, pre_ref, atol=1e-4), "pre_activ mismatch (f32)"

    # --- case 2: larger batch exercising the batch grid (bt=128, grid=(3,)) ---
    zs_big = jax.random.normal(k_zs_big, (384, zs_dim), jnp.float32)
    action_b, pre_b = policy_forward(zs_big, prep_f32, adim)
    jax.block_until_ready((action_b, pre_b))
    action_b_ref, pre_b_ref = policy_forward_ref(zs_big, params)
    assert action_b.shape == (384, action_dim)
    assert jnp.allclose(action_b, action_b_ref, atol=1e-4), "action mismatch (batched)"
    assert jnp.allclose(pre_b, pre_b_ref, atol=1e-4), "pre_activ mismatch (batched)"

    # --- case 3: non-tile-aligned batch (exercises padding path), f32 ---
    zs_odd = zs_big[:300]
    action_o, pre_o = policy_forward(zs_odd, prep_f32, adim)
    jax.block_until_ready((action_o, pre_o))
    assert action_o.shape == (300, action_dim)
    assert jnp.allclose(pre_o, pre_b_ref[:300], atol=1e-4), "pre_activ mismatch (odd B)"

    # --- case 4: default bf16 MXU weights, f32 LN/tanh (loose tolerance) ---
    action_bf, pre_bf = policy_forward(zs_big, prep_bf16, adim)
    jax.block_until_ready((action_bf, pre_bf))
    assert jnp.allclose(action_bf, action_b_ref, atol=1e-1), "action mismatch (bf16)"
    assert jnp.allclose(pre_bf, pre_b_ref, atol=1e-1), "pre_activ mismatch (bf16)"

    print("KERNEL_OK")
</pallas_src>

<mosaic_0001>
module attributes {stable_mosaic.version = 11 : i64} {
  func.func @_policy_kernel(%arg0: i32, %arg1: memref<8x32xf32, #tpu.memory_space<vmem>>, %arg2: memref<32x32xf32, #tpu.memory_space<vmem>>, %arg3: memref<1x32xf32, #tpu.memory_space<vmem>>, %arg4: memref<32x32xf32, #tpu.memory_space<vmem>>, %arg5: memref<1x32xf32, #tpu.memory_space<vmem>>, %arg6: memref<32x128xf32, #tpu.memory_space<vmem>>, %arg7: memref<1x128xf32, #tpu.memory_space<vmem>>, %arg8: memref<8x128xf32, #tpu.memory_space<vmem>>) attributes {dimension_semantics = [#tpu.dimension_semantics<parallel>], iteration_bounds = array<i64: 1>, scalar_prefetch = 0 : i64, scratch_operands = 0 : i64, tpu.core_type = #tpu.core_type<tc>, window_params = [{transform_indices = @transform_0, window_bounds = array<i64: 8, 32>}, {pipeline_mode = #tpu.pipeline_mode<synchronous>, transform_indices = @transform_1, window_bounds = array<i64: 32, 32>}, {pipeline_mode = #tpu.pipeline_mode<synchronous>, transform_indices = @transform_2, window_bounds = array<i64: 1, 32>}, {pipeline_mode = #tpu.pipeline_mode<synchronous>, transform_indices = @transform_3, window_bounds = array<i64: 32, 32>}, {pipeline_mode = #tpu.pipeline_mode<synchronous>, transform_indices = @transform_4, window_bounds = array<i64: 1, 32>}, {pipeline_mode = #tpu.pipeline_mode<synchronous>, transform_indices = @transform_5, window_bounds = array<i64: 32, 128>}, {pipeline_mode = #tpu.pipeline_mode<synchronous>, transform_indices = @transform_6, window_bounds = array<i64: 1, 128>}, {transform_indices = @transform_7, window_bounds = array<i64: 8, 128>}]} {
    %c0 = arith.constant 0 : index
    %c0_0 = arith.constant 0 : index
    %0 = vector.load %arg1[%c0, %c0_0] : memref<8x32xf32, #tpu.memory_space<vmem>>, vector<8x32xf32>
    %c0_1 = arith.constant 0 : index
    %c0_2 = arith.constant 0 : index
    %1 = vector.load %arg2[%c0_1, %c0_2] : memref<32x32xf32, #tpu.memory_space<vmem>>, vector<32x32xf32>
    %cst = arith.constant dense<0.000000e+00> : vector<8x32xf32>
    %2 = tpu.matmul %0, %1, %cst {dimension_numbers = #tpu.dot_dimension_numbers<[1], [0], [0], [1], [0, 0, 1, 1], [], []>} : vector<8x32xf32>, vector<32x32xf32>, vector<8x32xf32> -> vector<8x32xf32>
    %c0_3 = arith.constant 0 : index
    %c0_4 = arith.constant 0 : index
    %3 = vector.load %arg3[%c0_3, %c0_4] : memref<1x32xf32, #tpu.memory_space<vmem>>, vector<1x32xf32>
    %4 = vector.broadcast %3 : vector<1x32xf32> to vector<8x32xf32>
    %5 = arith.addf %2, %4 : vector<8x32xf32>
    %cst_5 = arith.constant dense<0.000000e+00> : vector<8xf32>
    %6 = vector.multi_reduction <add>, %5, %cst_5 [1] : vector<8x32xf32> to vector<8xf32>
    %7 = vector.shape_cast %6 : vector<8xf32> to vector<8x1xf32>
    %cst_6 = arith.constant 3.200000e+01 : f32
    %8 = vector.broadcast %cst_6 : f32 to vector<8x1xf32>
    %9 = arith.divf %7, %8 : vector<8x1xf32>
    %10 = arith.mulf %5, %5 : vector<8x32xf32>
    %cst_7 = arith.constant dense<0.000000e+00> : vector<8xf32>
    %11 = vector.multi_reduction <add>, %10, %cst_7 [1] : vector<8x32xf32> to vector<8xf32>
    %12 = vector.shape_cast %11 : vector<8xf32> to vector<8x1xf32>
    %cst_8 = arith.constant 3.200000e+01 : f32
    %13 = vector.broadcast %cst_8 : f32 to vector<8x1xf32>
    %14 = arith.divf %12, %13 : vector<8x1xf32>
    %15 = arith.mulf %9, %9 : vector<8x1xf32>
    %16 = arith.subf %14, %15 : vector<8x1xf32>
    %cst_9 = arith.constant 9.99999974E-6 : f32
    %17 = vector.broadcast %cst_9 : f32 to vector<8x1xf32>
    %18 = arith.addf %16, %17 : vector<8x1xf32>
    %19 = math.rsqrt %18 : vector<8x1xf32>
    %20 = vector.broadcast %9 : vector<8x1xf32> to vector<8x32xf32>
    %21 = arith.subf %5, %20 : vector<8x32xf32>
    %22 = vector.broadcast %19 : vector<8x1xf32> to vector<8x32xf32>
    %23 = arith.mulf %21, %22 : vector<8x32xf32>
    %cst_10 = arith.constant 0.000000e+00 : f32
    %24 = vector.broadcast %cst_10 : f32 to vector<8x32xf32>
    %25 = arith.maximumf %23, %24 : vector<8x32xf32>
    %c0_11 = arith.constant 0 : index
    %c0_12 = arith.constant 0 : index
    %26 = vector.load %arg4[%c0_11, %c0_12] : memref<32x32xf32, #tpu.memory_space<vmem>>, vector<32x32xf32>
    %cst_13 = arith.constant dense<0.000000e+00> : vector<8x32xf32>
    %27 = tpu.matmul %25, %26, %cst_13 {dimension_numbers = #tpu.dot_dimension_numbers<[1], [0], [0], [1], [0, 0, 1, 1], [], []>} : vector<8x32xf32>, vector<32x32xf32>, vector<8x32xf32> -> vector<8x32xf32>
    %c0_14 = arith.constant 0 : index
    %c0_15 = arith.constant 0 : index
    %28 = vector.load %arg5[%c0_14, %c0_15] : memref<1x32xf32, #tpu.memory_space<vmem>>, vector<1x32xf32>
    %29 = vector.broadcast %28 : vector<1x32xf32> to vector<8x32xf32>
    %30 = arith.addf %27, %29 : vector<8x32xf32>
    %cst_16 = arith.constant dense<0.000000e+00> : vector<8xf32>
    %31 = vector.multi_reduction <add>, %30, %cst_16 [1] : vector<8x32xf32> to vector<8xf32>
    %32 = vector.shape_cast %31 : vector<8xf32> to vector<8x1xf32>
    %cst_17 = arith.constant 3.200000e+01 : f32
    %33 = vector.broadcast %cst_17 : f32 to vector<8x1xf32>
    %34 = arith.divf %32, %33 : vector<8x1xf32>
    %35 = arith.mulf %30, %30 : vector<8x32xf32>
    %cst_18 = arith.constant dense<0.000000e+00> : vector<8xf32>
    %36 = vector.multi_reduction <add>, %35, %cst_18 [1] : vector<8x32xf32> to vector<8xf32>
    %37 = vector.shape_cast %36 : vector<8xf32> to vector<8x1xf32>
    %cst_19 = arith.constant 3.200000e+01 : f32
    %38 = vector.broadcast %cst_19 : f32 to vector<8x1xf32>
    %39 = arith.divf %37, %38 : vector<8x1xf32>
    %40 = arith.mulf %34, %34 : vector<8x1xf32>
    %41 = arith.subf %39, %40 : vector<8x1xf32>
    %cst_20 = arith.constant 9.99999974E-6 : f32
    %42 = vector.broadcast %cst_20 : f32 to vector<8x1xf32>
    %43 = arith.addf %41, %42 : vector<8x1xf32>
    %44 = math.rsqrt %43 : vector<8x1xf32>
    %45 = vector.broadcast %34 : vector<8x1xf32> to vector<8x32xf32>
    %46 = arith.subf %30, %45 : vector<8x32xf32>
    %47 = vector.broadcast %44 : vector<8x1xf32> to vector<8x32xf32>
    %48 = arith.mulf %46, %47 : vector<8x32xf32>
    %cst_21 = arith.constant 0.000000e+00 : f32
    %49 = vector.broadcast %cst_21 : f32 to vector<8x32xf32>
    %50 = arith.maximumf %48, %49 : vector<8x32xf32>
    %c0_22 = arith.constant 0 : index
    %c0_23 = arith.constant 0 : index
    %51 = vector.load %arg6[%c0_22, %c0_23] : memref<32x128xf32, #tpu.memory_space<vmem>>, vector<32x128xf32>
    %cst_24 = arith.constant dense<0.000000e+00> : vector<8x128xf32>
    %52 = tpu.matmul %50, %51, %cst_24 {dimension_numbers = #tpu.dot_dimension_numbers<[1], [0], [0], [1], [0, 0, 1, 1], [], []>} : vector<8x32xf32>, vector<32x128xf32>, vector<8x128xf32> -> vector<8x128xf32>
    %c0_25 = arith.constant 0 : index
    %c0_26 = arith.constant 0 : index
    %53 = vector.load %arg7[%c0_25, %c0_26] : memref<1x128xf32, #tpu.memory_space<vmem>>, vector<1x128xf32>
    %54 = vector.broadcast %53 : vector<1x128xf32> to vector<8x128xf32>
    %55 = arith.addf %52, %54 : vector<8x128xf32>
    %c0_27 = arith.constant 0 : index
    %c0_28 = arith.constant 0 : index
    %56 = vector.load %arg8[%c0_27, %c0_28] : memref<8x128xf32, #tpu.memory_space<vmem>>, vector<8x128xf32>
    tpu.vector_store %arg8[%c0_27, %c0_28], %55 {strides = array<i32>} : memref<8x128xf32, #tpu.memory_space<vmem>>, vector<8x128xf32>,
    return
  }
  func.func @transform_0(%arg0: i32) -> (i32, i32) {
    %c0_i32 = arith.constant 0 : i32
    %c0_i32_0 = arith.constant 0 : i32
    return %arg0, %c0_i32 : i32, i32
  }
  func.func @transform_1(%arg0: i32) -> (i32, i32) {
    %c0_i32 = arith.constant 0 : i32
    %c0_i32_0 = arith.constant 0 : i32
    %c0_i32_1 = arith.constant 0 : i32
    return %c0_i32, %c0_i32_0 : i32, i32
  }
  func.func @transform_2(%arg0: i32) -> (i32, i32) {
    %c0_i32 = arith.constant 0 : i32
    %c0_i32_0 = arith.constant 0 : i32
    %c0_i32_1 = arith.constant 0 : i32
    return %c0_i32, %c0_i32_0 : i32, i32
  }
  func.func @transform_3(%arg0: i32) -> (i32, i32) {
    %c0_i32 = arith.constant 0 : i32
    %c0_i32_0 = arith.constant 0 : i32
    %c0_i32_1 = arith.constant 0 : i32
    return %c0_i32, %c0_i32_0 : i32, i32
  }
  func.func @transform_4(%arg0: i32) -> (i32, i32) {
    %c0_i32 = arith.constant 0 : i32
    %c0_i32_0 = arith.constant 0 : i32
    %c0_i32_1 = arith.constant 0 : i32
    return %c0_i32, %c0_i32_0 : i32, i32
  }
  func.func @transform_5(%arg0: i32) -> (i32, i32) {
    %c0_i32 = arith.constant 0 : i32
    %c0_i32_0 = arith.constant 0 : i32
    %c0_i32_1 = arith.constant 0 : i32
    return %c0_i32, %c0_i32_0 : i32, i32
  }
  func.func @transform_6(%arg0: i32) -> (i32, i32) {
    %c0_i32 = arith.constant 0 : i32
    %c0_i32_0 = arith.constant 0 : i32
    %c0_i32_1 = arith.constant 0 : i32
    return %c0_i32, %c0_i32_0 : i32, i32
  }
  func.func @transform_7(%arg0: i32) -> (i32, i32) {
    %c0_i32 = arith.constant 0 : i32
    %c0_i32_0 = arith.constant 0 : i32
    return %arg0, %c0_i32 : i32, i32
  }
}

</mosaic_0001>

<bundles_post_ra>
// kernel: policy_forward.1
= control target key start
LH: loop header
LB: loop body
LE: loop exit
PB: predicated region body
PF: predicated region fallthrough
CT: control target
= control target key end

     0   :  { %12 = vsyncpa [#allocation3], 0  ;;  %s632_s0 = inlined_call_operand.hbm [shape: f32[8,32], index: 0, kind: input, shape index: {}]   ;;  %s633_s1 = inlined_call_operand.hbm [shape: f32[32,32], index: 1, kind: input, shape index: {}]   ;;  %s634_s2 = inlined_call_operand.vmem [shape: f32[1,32], index: 2, kind: input, shape index: {}]   ;;  %s635_s3 = inlined_call_operand.hbm [shape: f32[32,32], index: 3, kind: input, shape index: {}]   ;;  %s636_s4 = inlined_call_operand.vmem [shape: f32[1,32], index: 4, kind: input, shape index: {}]   ;;  %s637_s5 = inlined_call_operand.hbm [shape: f32[32,128], index: 5, kind: input, shape index: {}]   ;;  %s638_s6 = inlined_call_operand.vmem [shape: f32[1,128], index: 6, kind: input, shape index: {}]   ;;  %s639_s7 = inlined_call_operand.vmem [shape: f32[8,128], index: 7, kind: output, shape index: {}]  }
   0x1   :  { %13 = vsyncpa [#allocation5], 0 }
   0x2   :  { %14 = vsyncpa [#allocation8], 0  ;;  %s526_s24 = smov [#allocation4]  }
   0x3   :  { %s30_s25 = sshll.u32 %s526_s24, 4  ;;  %s31_s25 = int_to_ptr.vmem [resolvable:$true] %s30_s25 }
   0x4   :  { %s448_s26 = scalar_lea.vmem %s31_s25, 512  ;;  %p453_p1 = scmp.lt.s32.totalorder %s31_s25, %s31_s25 }
   0x5   :  { %p449_p0 = scmp.ne.s32.totalorder %s31_s25, %s448_s26  ;;  %p454_p2 = scmp.lt.s32.totalorder %s448_s26, %s448_s26 }
   0x7   :  { %p455_p3 = por %p454_p2, %p453_p1 }
   0x9   :  { %p456_p4 = pnand %p455_p3, %p449_p0 }
   0xb   :  { %459 = shalt.err (!%p456_p4)
}
   0xc   :  { %s527_s27 = smov 128   ;;  %s528_s28 = smov 8  }
   0xd   :  { %36 = dma.hbm_to_vmem [thread:$0]  %s633_s1, 512, %s31_s25, [#allocation5], %s527_s27, %s527_s27, %s528_s28  }
   0xe   :  { %s529_s8 = smov [#allocation2]   ;;  %s530_s10 = smov [#allocation6]  }
   0xf   :  { %s21_s9 = sshll.u32 %s529_s8, 4  ;;  %s44_s11 = sshll.u32 %s530_s10, 4  ;;  %s22_s9 = int_to_ptr.vmem [resolvable:$true] %s21_s9  ;;  %s45_s11 = int_to_ptr.vmem [resolvable:$true] %s44_s11 }
  0x10   :  { %s468_s12 = scalar_lea.vmem %s22_s9, 128  ;;  %p473_p6 = scmp.lt.s32.totalorder %s22_s9, %s22_s9 }
  0x11   :  { %p469_p5 = scmp.ne.s32.totalorder %s22_s9, %s468_s12  ;;  %p474_p7 = scmp.lt.s32.totalorder %s468_s12, %s468_s12 }
  0x13   :  { %p475_p8 = por %p474_p7, %p473_p6 }
  0x15   :  { %p476_p9 = pnand %p475_p8, %p469_p5 }
  0x17   :  { %479 = shalt.err (!%p476_p9)
}
  0x18   :  { %24 = dma.hbm_to_vmem [thread:$0]  %s632_s0, 128, %s22_s9, [#allocation3]  }
  0x19   :  { %s488_s15 = scalar_lea.vmem %s45_s11, 512  ;;  %p493_p11 = scmp.lt.s32.totalorder %s45_s11, %s45_s11 }
  0x1a   :  { %p489_p10 = scmp.ne.s32.totalorder %s45_s11, %s488_s15  ;;  %p494_p12 = scmp.lt.s32.totalorder %s488_s15, %s488_s15 }
  0x1c   :  { %p495_p13 = por %p494_p12, %p493_p11 }
  0x1e   :  { %p496_p0 = pnand %p495_p13, %p489_p10 }
  0x20   :  { %499 = shalt.err (!%p496_p0)
}
  0x21   :  { %50 = dma.hbm_to_vmem [thread:$0]  %s635_s3, 512, %s45_s11, [#allocation5], %s527_s27, %s527_s27, %s528_s28  }
  0x22   :  { %s531_s17 = smov [#allocation7]  }
  0x23   :  { %s58_s18 = sshll.u32 %s531_s17, 4  ;;  %s59_s18 = int_to_ptr.vmem [resolvable:$true] %s58_s18 }
  0x24   :  { %s508_s19 = scalar_lea.vmem %s59_s18, 512  ;;  %p513_p2 = scmp.lt.s32.totalorder %s59_s18, %s59_s18 }
  0x25   :  { %p509_p1 = scmp.ne.s32.totalorder %s59_s18, %s508_s19  ;;  %p514_p3 = scmp.lt.s32.totalorder %s508_s19, %s508_s19 }
  0x27   :  { %p515_p4 = por %p514_p3, %p513_p2 }
  0x29   :  { %p516_p5 = pnand %p515_p4, %p509_p1 }
  0x2b   :  { %519 = shalt.err (!%p516_p5)
}
  0x2c   :  { %64 = dma.hbm_to_vmem [thread:$0]  %s637_s5, 512, %s59_s18, [#allocation8], %s527_s27, %s527_s27, %s528_s28  }
  0x2d   :  { %520 = dma.done.wait [#allocation3], 128  }
  0x2e   :  { %521 = vsyncadd [#allocation3], 4294967168 }
  0x2f   :  { %522 = dma.done.wait [#allocation5], 1024  }
  0x30   :  { %523 = vsyncadd [#allocation5], 4294966272 }
  0x31   :  { %524 = dma.done.wait [#allocation8], 512  }
  0x32   :  { %525 = vsyncadd [#allocation8], 4294966784  ;;  %v532_v0 = vmov 0.0   ;;  %vm533_vm0 = vmmov 0   ;;  %v83_v1 = vld [vmem:[#allocation4 + $0x18] sm:$0xff]  ;;  %v82_v2 = vld [vmem:[#allocation4 + $0x10] sm:$0xff] }
  0x33   :  { %395 = vmatprep.subr.mxu0 %v532_v0  ;;  %403 = vmatprep.mubr.msk.f32.mxu0 %vm533_vm0, %v532_v0  ;;  %v81_v3 = vld [vmem:[#allocation4 + $0x8] sm:$0xff]  ;;  %v80_v4 = vld [vmem:[#allocation4] sm:$0xff]  ;;  %v79_v5 = vld [vmem:[#allocation2] sm:$0xff]  ;;  %vm91_vm1 = vcmask 261120  }
  0x34   :  { %406 = vmatprep.subr.mxu1 %v532_v0  ;;  %414 = vmatprep.mubr.msk.f32.mxu1 %vm533_vm0, %v532_v0  ;;  %v374_v6 = vld [vmem:[%s634_s2] ss:$0 sm:$0xff]  ;;  %v184_v14 = vld [vmem:[#allocation6 + $0x10] sm:$0xff]  ;;  %v183_v15 = vld [vmem:[#allocation6 + $0x8] sm:$0xff] }
  0x35   :  { %396 = vmatpush3.msra.mxu0 %v83_v1  ;;  %v185_v13 = vld [vmem:[#allocation6 + $0x18] sm:$0xff]  ;;  %v182_v16 = vld [vmem:[#allocation6] sm:$0xff]  ;;  %v284_v36 = vld [vmem:[#allocation7 + $0x10] sm:$0xff] }
  0x36   :  { %397 = vmatprep.subr.mxu0 %v532_v0  ;;  %407 = vmatpush3.msra.mxu1 %v185_v13  ;;  %v376_v28 = vld [vmem:[%s636_s4] ss:$0 sm:$0xff]  ;;  %v283_v37 = vld [vmem:[#allocation7 + $0x8] sm:$0xff]  ;;  %v282_v38 = vld [vmem:[#allocation7] sm:$0xff] }
  0x37   :  { %398 = vmatpush3.msra.mxu0 %v82_v2  ;;  %408 = vmatprep.subr.mxu1 %v532_v0  ;;  %v285_v35 = vld [vmem:[#allocation7 + $0x18] sm:$0xff] }
  0x38   :  { %399 = vmatprep.subr.mxu0 %v532_v0  ;;  %409 = vmatpush3.msra.mxu1 %v184_v14  ;;  %v378_v50 = vld [vmem:[%s638_s6] ss:$0 sm:$0xff] }
  0x39   :  { %400 = vmatpush3.msra.mxu0 %v81_v3  ;;  %410 = vmatprep.subr.mxu1 %v532_v0 }
  0x3a   :  { %401 = vmatprep.subr.mxu0 %v532_v0  ;;  %411 = vmatpush3.msra.mxu1 %v183_v15 }
  0x3b   :  { %402 = vmatpush3.msra.mxu0 %v80_v4  ;;  %412 = vmatprep.subr.mxu1 %v532_v0 }
  0x3c   :  { %404 = vmatmul.mubr.msk.f32.vlgmr.msra.gmra.mxu0 %vm91_vm1, %v79_v5  ;;  %417 = vmatprep.subr.mxu0 %v532_v0 }
  0x3d   :  { %425 = vmatprep.mubr.msk.f32.mxu0 %vm533_vm0, %v532_v0  ;;  %413 = vmatpush3.msra.mxu1 %v182_v16 }
  0x3e   :  { %418 = vmatpush3.msra.mxu0 %v285_v35 }
  0x3f   :  { %419 = vmatprep.subr.mxu0 %v532_v0 }
  0x40   :  { %420 = vmatpush3.msra.mxu0 %v284_v36 }
  0x41   :  { %421 = vmatprep.subr.mxu0 %v532_v0 }
  0x42   :  { %422 = vmatpush3.msra.mxu0 %v283_v37 }
  0x43   :  { %423 = vmatprep.subr.mxu0 %v532_v0 }
  0x44   :  { %424 = vmatpush3.msra.mxu0 %v282_v38 }
  0xfc   :  { %v161_v7 = vpop.f32.mrf.mxu0 }
  0xfd   :  { %v162_v8 = vadd.f32 %v374_v6, %v161_v7 }
  0xfe   :  { %v405_v9 = vpop.f32.mrf.mxu0 }
  0xff   :  { %v165_v10 = vsel %vm91_vm1, %v162_v8, 0.0  ;;  %v170_v11 = vmul.f32 %v162_v8, %v162_v8 }
 0x100   :  { %166 = vadd.xlane.f32.xlu0 %v165_v10 }
 0x101   :  { %v171_v12 = vsel %vm91_vm1, %v170_v11, 0.0 }
 0x104   :  { %172 = vadd.xlane.f32.xlu0 %v171_v12 }
 0x189   :  { %v167_v17 = vpop.xlane.xlu0 %166 }
 0x18a   :  { %v169_v18 = vmul.f32 0.03125, %v167_v17 }
 0x18c   :  { %v175_v20 = vmul.f32 %v169_v18, %v169_v18  ;;  %v179_v24 = vsub.f32 %v162_v8, %v169_v18 }
 0x18d   :  { %v173_v19 = vpop.xlane.xlu0 %172 }
 0x18e   :  { %v174_v21 = vmul.f32 0.03125, %v173_v19 }
 0x190   :  { %v176_v22 = vsub.f32 %v174_v21, %v175_v20 }
 0x192   :  { %v177_v23 = vadd.f32 1e-05, %v176_v22 }
 0x194   :  { %436 = vrsqrt.f32 %v177_v23 }
 0x1a1   :  { %v437_v25 = vpop.eup %436 }
 0x1a2   :  { %v180_v26 = vmul.f32 %v437_v25, %v179_v24 }
 0x1a4   :  { %v181_v27 = vmax.f32 %v180_v26, 0.0 }
 0x1a6   :  { %415 = vmatmul.mubr.msk.f32.vlgmr.msra.gmra.mxu1 %vm91_vm1, %v181_v27 }
 0x266   :  { %v262_v29 = vpop.f32.mrf.mxu1 }
 0x267   :  { %v263_v30 = vadd.f32 %v376_v28, %v262_v29 }
 0x268   :  { %v416_v31 = vpop.f32.mrf.mxu1 }
 0x269   :  { %v266_v32 = vsel %vm91_vm1, %v263_v30, 0.0  ;;  %v270_v33 = vmul.f32 %v263_v30, %v263_v30 }
 0x26a   :  { %267 = vadd.xlane.f32.xlu1 %v266_v32 }
 0x26b   :  { %v271_v34 = vsel %vm91_vm1, %v270_v33, 0.0 }
 0x26e   :  { %272 = vadd.xlane.f32.xlu1 %v271_v34 }
 0x2f3   :  { %v268_v39 = vpop.xlane.xlu1 %267 }
 0x2f4   :  { %v269_v40 = vmul.f32 0.03125, %v268_v39 }
 0x2f6   :  { %v275_v42 = vmul.f32 %v269_v40, %v269_v40  ;;  %v279_v46 = vsub.f32 %v263_v30, %v269_v40 }
 0x2f7   :  { %v273_v41 = vpop.xlane.xlu1 %272 }
 0x2f8   :  { %v274_v43 = vmul.f32 0.03125, %v273_v41 }
 0x2fa   :  { %v276_v44 = vsub.f32 %v274_v43, %v275_v42 }
 0x2fc   :  { %v277_v45 = vadd.f32 1e-05, %v276_v44 }
 0x2fe   :  { %438 = vrsqrt.f32 %v277_v45 }
 0x30b   :  { %v439_v47 = vpop.eup %438 }
 0x30c   :  { %v280_v48 = vmul.f32 %v439_v47, %v279_v46 }
 0x30e   :  { %v281_v49 = vmax.f32 %v280_v48, 0.0 }
 0x310   :  { %426 = vmatmul.mubr.msk.f32.vlgmr.msra.gmra.mxu0 %vm91_vm1, %v281_v49 }
 0x3d0   :  { %v362_v51 = vpop.f32.mrf.mxu0 }
 0x3d1   :  { %v363_v52 = vadd.f32 %v378_v50, %v362_v51 }
 0x3d2   :  { %v427_v53 = vpop.f32.mrf.mxu0 }
 0x3d3   :  { %366 = vst [vmem:[%s639_s7] sm:$0xff] %v363_v52 }
 0x3d4   :  { %371 = vsyncpa [#allocation3], 1 }
 0x3d5   :  { %372 = vsyncpa [#allocation5], 1 }
 0x3d6   :  { %373 = vsyncpa [#allocation8], 1 }

</bundles_post_ra>
